<compile_context>
chip_gen: v6e
topology: v6e:2x2x1
jax: 0.10.0
libtpu: 0.0.40
codegen_flags: <defaults>
</compile_context>

<pallas_src>
import functools

import jax
import jax.numpy as jnp
from jax import lax
from jax.experimental import pallas as pl
from jax.experimental.pallas import tpu as pltpu

_LANE = 128


def _round_up(a, b):
    return -(-a // b) * b


def _vmem_capacity_bytes():
    try:
        return int(pltpu.get_tpu_info().vmem_capacity_bytes)
    except Exception:
        return 64 << 20  # conservative fallback (v7x per-core VMEM)


def _vmem_limit_bytes(C_in_p, F_p, K, TL, pad, has_downsample, w_itemsize):
    """Rough VMEM estimate (double-buffered blocks + live temporaries)."""
    TLh = TL + 2 * pad
    by = 0
    by += 3 * 2 * C_in_p * TL * 4                      # x neighbor blocks (x2 buffers)
    by += 2 * F_p * (K * C_in_p) * w_itemsize          # w1
    by += 2 * F_p * (K * F_p) * w_itemsize             # w2
    by += 2 * 2 * max(F_p, 8) * _LANE * 4              # b1, b2 (lane padded)
    if has_downsample:
        by += 2 * F_p * max(C_in_p, _LANE) * w_itemsize
        by += 2 * max(F_p, 8) * _LANE * 4
    by += 2 * F_p * TL * 4                             # output block
    # live temporaries: xfull, xcat, h, hcat, out/res
    by += (3 * C_in_p * TL + K * C_in_p * TLh + 2 * F_p * TLh
           + K * F_p * TLh + 2 * F_p * TL) * 4
    cap = _vmem_capacity_bytes()
    return int(min(max(2 * by, 32 << 20), int(0.85 * cap)))


def _residual_block_kernel(xl_ref, xc_ref, xr_ref, w1_ref, b1_ref, w2_ref, b2_ref,
                           *rest, L, TL, K, dilation, pad, has_downsample,
                           matmul_dtype):
    """One (batch, L-tile) grid step, channels-first layout.

    xl/xc/xr_ref : (1, C_in_p, TL)   left / center / right blocks of padded x
    w1_ref       : (F_p, K*C_in_p)   conv1 weight, tap-major (pre-cast)
    b1_ref       : (F_p, 1)          f32
    w2_ref       : (F_p, K*F_p)      conv2 weight, tap-major (pre-cast)
    b2_ref       : (F_p, 1)          f32
    wd_ref       : (F_p, C_in_p)     (only if downsample) 1x1 weight (pre-cast)
    bd_ref       : (F_p, 1)
    o_ref        : (1, F_p, TL)      output tile (lane-dense along L)
    """
    if has_downsample:
        wd_ref, bd_ref, o_ref = rest
    else:
        (o_ref,) = rest

    TLh = TL + 2 * pad
    cast = (lambda a: a) if matmul_dtype is None else (lambda a: a.astype(matmul_dtype))

    # Halo'd x window for this tile: local index u <-> global position j*TL + (u - TL).
    xfull = jnp.concatenate([xl_ref[0], xc_ref[0], xr_ref[0]], axis=1)  # (C_in_p, 3*TL)

    # ---- conv1 + ReLU: all K taps fused into a single MXU matmul (static slices).
    xcat = jnp.concatenate(
        [xfull[:, TL - 2 * pad + t * dilation: TL - 2 * pad + t * dilation + TLh]
         for t in range(K)], axis=0)                                    # (K*C_in_p, TLh)
    h = jnp.dot(w1_ref[...], cast(xcat),
                preferred_element_type=jnp.float32) + b1_ref[...]
    h = jnp.maximum(h, 0.0)

    # Halo lanes outside [0, L) correspond to conv2's zero padding -> mask to zero.
    j = pl.program_id(1)
    q = lax.broadcasted_iota(jnp.int32, (1, TLh), 1)
    g = q + (j * TL - pad)                   # global L position of each h lane
    h = jnp.where((g >= 0) & (g < L), h, 0.0)

    # ---- conv2: K taps fused, reads h directly (no scratch round trip).
    hcat = jnp.concatenate(
        [h[:, t * dilation:t * dilation + TL] for t in range(K)], axis=0)
    out = jnp.dot(w2_ref[...], cast(hcat),
                  preferred_element_type=jnp.float32) + b2_ref[...]

    # ---- residual: 1x1 downsample or identity (statically specialized).
    x_c = xc_ref[0]                                                     # (C_in_p, TL)
    if has_downsample:
        res = jnp.dot(wd_ref[...], cast(x_c),
                      preferred_element_type=jnp.float32) + bd_ref[...]
    else:
        res = x_c

    o_ref[0] = jnp.maximum(out + res, 0.0)


def residual_block(x, params, *, kernel_size, dilation, tl_max=None,
                   matmul_dtype=jnp.bfloat16):
    """x: (N, C_in, L) float32 (PyTorch NCL). Returns (N, F, L) float32."""
    w1, b1, w2, b2, wd, bd = params
    N, C_in, L = x.shape
    F = w1.shape[0]
    K = kernel_size
    if dilation * (K - 1) % 2 != 0:
        raise ValueError("ResidualBlock assumes same-length convs: "
                         "(kernel_size-1)*dilation must be even.")
    pad = dilation * (K - 1) // 2

    sub = 16 if matmul_dtype == jnp.bfloat16 else 8
    C_in_p = _round_up(C_in, sub)
    F_p = _round_up(F, sub)

    cap = _vmem_capacity_bytes()
    if tl_max is None:
        tl_max = 2048 if cap >= (96 << 20) else 1024   # bigger tiles on 128 MiB chips
    min_tl = _round_up(max(2 * pad, 1), _LANE)          # halo slices need TL >= 2*pad
    tl_max = max(_round_up(tl_max, _LANE), min_tl)

    if L <= tl_max:
        TL = max(min_tl, _round_up(L, _LANE))
        n_lt = 1
    else:
        TL = tl_max
        n_lt = pl.cdiv(L, TL)
    # v7x has 2 TensorCores: make sure a single-example call still has >= 2 steps.
    if N == 1 and n_lt == 1 and _round_up(L, _LANE) >= 2 * max(min_tl, _LANE):
        TL = max(min_tl, _round_up(pl.cdiv(L, 2), _LANE))
        n_lt = pl.cdiv(L, TL)
    Lr = n_lt * TL

    # Zero-pad: channels -> sublane multiple; L -> one neighbor tile on each side plus
    # round-up to Lr.  x stays f32 (activations are cast in-kernel if requested).
    x3 = jnp.pad(x, ((0, 0), (0, C_in_p - C_in), (TL, TL + Lr - L)))

    w_dt = jnp.float32 if matmul_dtype is None else matmul_dtype

    def prep_w(w, ci_p):
        # PyTorch Conv1d weight (C_out, C_in, K) -> tap-major flattened (F_p, K*ci_p).
        f, ci, k = w.shape
        wp = jnp.pad(w, ((0, F_p - f), (0, ci_p - ci), (0, 0)))
        return jnp.transpose(wp, (0, 2, 1)).reshape(F_p, k * ci_p).astype(w_dt)

    w1_f = prep_w(w1, C_in_p)
    w2_f = prep_w(w2, F_p)
    b1_v = jnp.pad(b1, (0, F_p - F)).reshape(F_p, 1).astype(jnp.float32)
    b2_v = jnp.pad(b2, (0, F_p - F)).reshape(F_p, 1).astype(jnp.float32)

    has_ds = wd is not None
    args = [x3, x3, x3, w1_f, b1_v, w2_f, b2_v]
    in_specs = [
        pl.BlockSpec((1, C_in_p, TL), lambda i, j: (i, 0, j)),       # left halo block
        pl.BlockSpec((1, C_in_p, TL), lambda i, j: (i, 0, j + 1)),   # center block
        pl.BlockSpec((1, C_in_p, TL), lambda i, j: (i, 0, j + 2)),   # right halo block
        pl.BlockSpec((F_p, K * C_in_p), lambda i, j: (0, 0)),        # w1
        pl.BlockSpec((F_p, 1), lambda i, j: (0, 0)),                 # b1
        pl.BlockSpec((F_p, K * F_p), lambda i, j: (0, 0)),           # w2
        pl.BlockSpec((F_p, 1), lambda i, j: (0, 0)),                 # b2
    ]
    if has_ds:
        wd_f = jnp.pad(wd[:, :, 0], ((0, F_p - F), (0, C_in_p - C_in))).astype(w_dt)
        bd_v = jnp.pad(bd, (0, F_p - F)).reshape(F_p, 1).astype(jnp.float32)
        args += [wd_f, bd_v]
        in_specs += [pl.BlockSpec((F_p, C_in_p), lambda i, j: (0, 0)),
                     pl.BlockSpec((F_p, 1), lambda i, j: (0, 0))]

    kern = functools.partial(_residual_block_kernel,
                             L=L, TL=TL, K=K, dilation=dilation, pad=pad,
                             has_downsample=has_ds, matmul_dtype=matmul_dtype)

    out = pl.pallas_call(
        kern,
        out_shape=jax.ShapeDtypeStruct((N, F_p, Lr), jnp.float32),
        grid_spec=pltpu.PrefetchScalarGridSpec(
            num_scalar_prefetch=0,
            grid=(N, n_lt),
            in_specs=in_specs,
            out_specs=pl.BlockSpec((1, F_p, TL), lambda i, j: (i, 0, j)),
        ),
        compiler_params=pltpu.CompilerParams(
            dimension_semantics=("parallel", "parallel"),
            vmem_limit_bytes=_vmem_limit_bytes(
                C_in_p, F_p, K, TL, pad, has_ds,
                2 if matmul_dtype == jnp.bfloat16 else 4)),
    )(*args)

    return out[:, :F, :L] if (F_p != F or Lr != L) else out


def residual_block_reference(x, params, kernel_size, dilation):
    """Pure-JAX reference matching the PyTorch forward (NCL)."""
    w1, b1, w2, b2, wd, bd = params
    pad = dilation * (kernel_size - 1) // 2
    dn = ("NCH", "OIH", "NCH")

    def conv(a, w, b, dil, p):
        y = lax.conv_general_dilated(a, w, window_strides=(1,),
                                     padding=[(p, p)], rhs_dilation=(dil,),
                                     dimension_numbers=dn)
        return y + b[None, :, None]

    out = jax.nn.relu(conv(x, w1, b1, dilation, pad))
    out = conv(out, w2, b2, dilation, pad)
    residual = x if wd is None else conv(x, wd, bd, 1, 0)
    return jax.nn.relu(out + residual)


def _make_params(key, C_in, F, K, with_downsample):
    ks = jax.random.split(key, 7)
    w1 = jax.random.normal(ks[0], (F, C_in, K), jnp.float32) * 0.3
    b1 = jax.random.normal(ks[1], (F,), jnp.float32) * 0.1
    w2 = jax.random.normal(ks[2], (F, F, K), jnp.float32) * 0.3
    b2 = jax.random.normal(ks[3], (F,), jnp.float32) * 0.1
    if with_downsample:
        wd = jax.random.normal(ks[4], (F, C_in, 1), jnp.float32) * 0.3
        bd = jax.random.normal(ks[5], (F,), jnp.float32) * 0.1
    else:
        wd, bd = None, None
    return (w1, b1, w2, b2, wd, bd)


if __name__ == "__main__":
    root = jax.random.PRNGKey(0)
    k_case = jax.random.split(root, 8)

    # Case 1: downsample residual (C_in != F), f32 matmuls, tight tolerance.
    N, C_in, L, F, K, dil = 2, 4, 16, 8, 3, 2
    x = jax.random.normal(k_case[0], (N, C_in, L), jnp.float32)
    p1 = _make_params(k_case[1], C_in, F, K, with_downsample=True)
    out = jax.block_until_ready(
        residual_block(x, p1, kernel_size=K, dilation=dil, matmul_dtype=None))
    ref = residual_block_reference(x, p1, K, dil)
    assert out.shape == (N, F, L), out.shape
    assert jnp.allclose(out, ref, atol=1e-4, rtol=1e-4), \
        float(jnp.max(jnp.abs(out - ref)))

    # Case 2: identity residual (C_in == F), default bf16 matmul path.
    x2 = jax.random.normal(k_case[2], (N, F, L), jnp.float32)
    p2 = _make_params(k_case[3], F, F, K, with_downsample=False)
    out2 = jax.block_until_ready(residual_block(x2, p2, kernel_size=K, dilation=1))
    ref2 = residual_block_reference(x2, p2, K, 1)
    assert out2.shape == (N, F, L), out2.shape
    assert jnp.allclose(out2, ref2, atol=5e-2, rtol=5e-2), \
        float(jnp.max(jnp.abs(out2 - ref2)))

    # Case 3: N == 1, longer L -> forced 2-tile split (dual-TensorCore path), f32.
    L3 = 300
    x3 = jax.random.normal(k_case[4], (1, C_in, L3), jnp.float32)
    out3 = jax.block_until_ready(
        residual_block(x3, p1, kernel_size=K, dilation=dil, matmul_dtype=None))
    ref3 = residual_block_reference(x3, p1, K, dil)
    assert out3.shape == (1, F, L3), out3.shape
    assert jnp.allclose(out3, ref3, atol=1e-4, rtol=1e-4), \
        float(jnp.max(jnp.abs(out3 - ref3)))

    # Case 4: multi-tile halo path (tl_max=128 -> 3 L-tiles), dilation 4, identity res.
    x4 = jax.random.normal(k_case[5], (2, F, L3), jnp.float32)
    p4 = _make_params(k_case[6], F, F, K, with_downsample=False)
    out4 = jax.block_until_ready(
        residual_block(x4, p4, kernel_size=K, dilation=4, tl_max=128,
                       matmul_dtype=None))
    ref4 = residual_block_reference(x4, p4, K, 4)
    assert out4.shape == (2, F, L3), out4.shape
    assert jnp.allclose(out4, ref4, atol=1e-4, rtol=1e-4), \
        float(jnp.max(jnp.abs(out4 - ref4)))

    print("KERNEL_OK")
</pallas_src>

<mosaic_0001>
module attributes {stable_mosaic.version = 11 : i64} {
  func.func @_residual_block_kernel(%arg0: i32, %arg1: i32, %arg2: memref<1x8x128xf32, #tpu.memory_space<vmem>>, %arg3: memref<1x8x128xf32, #tpu.memory_space<vmem>>, %arg4: memref<1x8x128xf32, #tpu.memory_space<vmem>>, %arg5: memref<8x24xf32, #tpu.memory_space<vmem>>, %arg6: memref<8x1xf32, #tpu.memory_space<vmem>>, %arg7: memref<8x24xf32, #tpu.memory_space<vmem>>, %arg8: memref<8x1xf32, #tpu.memory_space<vmem>>, %arg9: memref<8x8xf32, #tpu.memory_space<vmem>>, %arg10: memref<8x1xf32, #tpu.memory_space<vmem>>, %arg11: memref<1x8x128xf32, #tpu.memory_space<vmem>>) attributes {dimension_semantics = [#tpu.dimension_semantics<parallel>, #tpu.dimension_semantics<parallel>], iteration_bounds = array<i64: 2, 1>, scalar_prefetch = 0 : i64, scratch_operands = 0 : i64, tpu.core_type = #tpu.core_type<tc>, window_params = [{transform_indices = @transform_0, window_bounds = array<i64: 1, 8, 128>}, {transform_indices = @transform_1, window_bounds = array<i64: 1, 8, 128>}, {transform_indices = @transform_2, window_bounds = array<i64: 1, 8, 128>}, {pipeline_mode = #tpu.pipeline_mode<synchronous>, transform_indices = @transform_3, window_bounds = array<i64: 8, 24>}, {pipeline_mode = #tpu.pipeline_mode<synchronous>, transform_indices = @transform_4, window_bounds = array<i64: 8, 1>}, {pipeline_mode = #tpu.pipeline_mode<synchronous>, transform_indices = @transform_5, window_bounds = array<i64: 8, 24>}, {pipeline_mode = #tpu.pipeline_mode<synchronous>, transform_indices = @transform_6, window_bounds = array<i64: 8, 1>}, {pipeline_mode = #tpu.pipeline_mode<synchronous>, transform_indices = @transform_7, window_bounds = array<i64: 8, 8>}, {pipeline_mode = #tpu.pipeline_mode<synchronous>, transform_indices = @transform_8, window_bounds = array<i64: 8, 1>}, {transform_indices = @transform_9, window_bounds = array<i64: 1, 8, 128>}]} {
    %c0 = arith.constant 0 : index
    %c0_0 = arith.constant 0 : index
    %c0_1 = arith.constant 0 : index
    %0 = vector.load %arg2[%c0, %c0_0, %c0_1] : memref<1x8x128xf32, #tpu.memory_space<vmem>>, vector<1x8x128xf32>
    %1 = vector.shape_cast %0 : vector<1x8x128xf32> to vector<8x128xf32>
    %c0_2 = arith.constant 0 : index
    %c0_3 = arith.constant 0 : index
    %c0_4 = arith.constant 0 : index
    %2 = vector.load %arg3[%c0_2, %c0_3, %c0_4] : memref<1x8x128xf32, #tpu.memory_space<vmem>>, vector<1x8x128xf32>
    %3 = vector.shape_cast %2 : vector<1x8x128xf32> to vector<8x128xf32>
    %c0_5 = arith.constant 0 : index
    %c0_6 = arith.constant 0 : index
    %c0_7 = arith.constant 0 : index
    %4 = vector.load %arg4[%c0_5, %c0_6, %c0_7] : memref<1x8x128xf32, #tpu.memory_space<vmem>>, vector<1x8x128xf32>
    %5 = vector.shape_cast %4 : vector<1x8x128xf32> to vector<8x128xf32>
    %6 = tpu.concatenate %1, %3, %5 in 1 : vector<8x128xf32>, vector<8x128xf32>, vector<8x128xf32> -> vector<8x384xf32>
    %7 = vector.extract_strided_slice %6 {offsets = [0, 124], sizes = [8, 132], strides = [1, 1]} : vector<8x384xf32> to vector<8x132xf32>
    %8 = vector.extract_strided_slice %6 {offsets = [0, 126], sizes = [8, 132], strides = [1, 1]} : vector<8x384xf32> to vector<8x132xf32>
    %9 = vector.extract_strided_slice %6 {offsets = [0, 128], sizes = [8, 132], strides = [1, 1]} : vector<8x384xf32> to vector<8x132xf32>
    %10 = tpu.concatenate %7, %8, %9 in 0 : vector<8x132xf32>, vector<8x132xf32>, vector<8x132xf32> -> vector<24x132xf32>
    %c0_8 = arith.constant 0 : index
    %c0_9 = arith.constant 0 : index
    %11 = vector.load %arg5[%c0_8, %c0_9] : memref<8x24xf32, #tpu.memory_space<vmem>>, vector<8x24xf32>
    %cst = arith.constant dense<0.000000e+00> : vector<8x132xf32>
    %12 = tpu.matmul %11, %10, %cst {dimension_numbers = #tpu.dot_dimension_numbers<[1], [0], [0], [1], [0, 0, 1, 1], [], []>} : vector<8x24xf32>, vector<24x132xf32>, vector<8x132xf32> -> vector<8x132xf32>
    %c0_10 = arith.constant 0 : index
    %c0_11 = arith.constant 0 : index
    %13 = vector.load %arg6[%c0_10, %c0_11] : memref<8x1xf32, #tpu.memory_space<vmem>>, vector<8x1xf32>
    %14 = vector.broadcast %13 : vector<8x1xf32> to vector<8x132xf32>
    %15 = arith.addf %12, %14 : vector<8x132xf32>
    %cst_12 = arith.constant 0.000000e+00 : f32
    %16 = vector.broadcast %cst_12 : f32 to vector<8x132xf32>
    %17 = arith.maximumf %15, %16 : vector<8x132xf32>
    %18 = tpu.iota {dimensions = array<i32: 1>} : vector<1x132xi32>
    %c128_i32 = arith.constant 128 : i32
    %19 = arith.muli %arg1, %c128_i32 : i32
    %c2_i32 = arith.constant 2 : i32
    %20 = arith.subi %19, %c2_i32 : i32
    %21 = vector.broadcast %20 : i32 to vector<1x132xi32>
    %22 = arith.addi %18, %21 : vector<1x132xi32>
    %c0_i32 = arith.constant 0 : i32
    %23 = vector.broadcast %c0_i32 : i32 to vector<1x132xi32>
    %24 = arith.cmpi sge, %22, %23 : vector<1x132xi32>
    %c16_i32 = arith.constant 16 : i32
    %25 = vector.broadcast %c16_i32 : i32 to vector<1x132xi32>
    %26 = arith.cmpi slt, %22, %25 : vector<1x132xi32>
    %27 = arith.andi %24, %26 : vector<1x132xi1>
    %cst_13 = arith.constant 0.000000e+00 : f32
    %28 = vector.shape_cast %27 : vector<1x132xi1> to vector<1x132xi1>
    %29 = vector.broadcast %28 : vector<1x132xi1> to vector<8x132xi1>
    %30 = vector.broadcast %cst_13 : f32 to vector<8x132xf32>
    %31 = arith.select %29, %17, %30 : vector<8x132xi1>, vector<8x132xf32>
    %32 = vector.extract_strided_slice %31 {offsets = [0, 0], sizes = [8, 128], strides = [1, 1]} : vector<8x132xf32> to vector<8x128xf32>
    %33 = vector.extract_strided_slice %31 {offsets = [0, 2], sizes = [8, 128], strides = [1, 1]} : vector<8x132xf32> to vector<8x128xf32>
    %34 = vector.extract_strided_slice %31 {offsets = [0, 4], sizes = [8, 128], strides = [1, 1]} : vector<8x132xf32> to vector<8x128xf32>
    %35 = tpu.concatenate %32, %33, %34 in 0 : vector<8x128xf32>, vector<8x128xf32>, vector<8x128xf32> -> vector<24x128xf32>
    %c0_14 = arith.constant 0 : index
    %c0_15 = arith.constant 0 : index
    %36 = vector.load %arg7[%c0_14, %c0_15] : memref<8x24xf32, #tpu.memory_space<vmem>>, vector<8x24xf32>
    %cst_16 = arith.constant dense<0.000000e+00> : vector<8x128xf32>
    %37 = tpu.matmul %36, %35, %cst_16 {dimension_numbers = #tpu.dot_dimension_numbers<[1], [0], [0], [1], [0, 0, 1, 1], [], []>} : vector<8x24xf32>, vector<24x128xf32>, vector<8x128xf32> -> vector<8x128xf32>
    %c0_17 = arith.constant 0 : index
    %c0_18 = arith.constant 0 : index
    %38 = vector.load %arg8[%c0_17, %c0_18] : memref<8x1xf32, #tpu.memory_space<vmem>>, vector<8x1xf32>
    %39 = vector.broadcast %38 : vector<8x1xf32> to vector<8x128xf32>
    %40 = arith.addf %37, %39 : vector<8x128xf32>
    %c0_19 = arith.constant 0 : index
    %c0_20 = arith.constant 0 : index
    %c0_21 = arith.constant 0 : index
    %41 = vector.load %arg3[%c0_19, %c0_20, %c0_21] : memref<1x8x128xf32, #tpu.memory_space<vmem>>, vector<1x8x128xf32>
    %42 = vector.shape_cast %41 : vector<1x8x128xf32> to vector<8x128xf32>
    %c0_22 = arith.constant 0 : index
    %c0_23 = arith.constant 0 : index
    %43 = vector.load %arg9[%c0_22, %c0_23] : memref<8x8xf32, #tpu.memory_space<vmem>>, vector<8x8xf32>
    %cst_24 = arith.constant dense<0.000000e+00> : vector<8x128xf32>
    %44 = tpu.matmul %43, %42, %cst_24 {dimension_numbers = #tpu.dot_dimension_numbers<[1], [0], [0], [1], [0, 0, 1, 1], [], []>} : vector<8x8xf32>, vector<8x128xf32>, vector<8x128xf32> -> vector<8x128xf32>
    %c0_25 = arith.constant 0 : index
    %c0_26 = arith.constant 0 : index
    %45 = vector.load %arg10[%c0_25, %c0_26] : memref<8x1xf32, #tpu.memory_space<vmem>>, vector<8x1xf32>
    %46 = vector.broadcast %45 : vector<8x1xf32> to vector<8x128xf32>
    %47 = arith.addf %44, %46 : vector<8x128xf32>
    %48 = arith.addf %40, %47 : vector<8x128xf32>
    %cst_27 = arith.constant 0.000000e+00 : f32
    %49 = vector.broadcast %cst_27 : f32 to vector<8x128xf32>
    %50 = arith.maximumf %48, %49 : vector<8x128xf32>
    %c0_28 = arith.constant 0 : index
    %c0_29 = arith.constant 0 : index
    %c0_30 = arith.constant 0 : index
    %51 = vector.load %arg11[%c0_28, %c0_29, %c0_30] : memref<1x8x128xf32, #tpu.memory_space<vmem>>, vector<1x8x128xf32>
    %52 = vector.shape_cast %51 : vector<1x8x128xf32> to vector<8x128xf32>
    %53 = vector.shape_cast %50 : vector<8x128xf32> to vector<1x8x128xf32>
    tpu.vector_store %arg11[%c0_28, %c0_29, %c0_30], %53 {strides = array<i32>} : memref<1x8x128xf32, #tpu.memory_space<vmem>>, vector<1x8x128xf32>,
    return
  }
  func.func @transform_0(%arg0: i32, %arg1: i32) -> (i32, i32, i32) {
    %c0_i32 = arith.constant 0 : i32
    %c0_i32_0 = arith.constant 0 : i32
    return %arg0, %c0_i32, %arg1 : i32, i32, i32
  }
  func.func @transform_1(%arg0: i32, %arg1: i32) -> (i32, i32, i32) {
    %c1_i32 = arith.constant 1 : i32
    %0 = arith.addi %arg1, %c1_i32 : i32
    %c0_i32 = arith.constant 0 : i32
    %c0_i32_0 = arith.constant 0 : i32
    return %arg0, %c0_i32, %0 : i32, i32, i32
  }
  func.func @transform_2(%arg0: i32, %arg1: i32) -> (i32, i32, i32) {
    %c2_i32 = arith.constant 2 : i32
    %0 = arith.addi %arg1, %c2_i32 : i32
    %c0_i32 = arith.constant 0 : i32
    %c0_i32_0 = arith.constant 0 : i32
    return %arg0, %c0_i32, %0 : i32, i32, i32
  }
  func.func @transform_3(%arg0: i32, %arg1: i32) -> (i32, i32) {
    %c0_i32 = arith.constant 0 : i32
    %c0_i32_0 = arith.constant 0 : i32
    %c0_i32_1 = arith.constant 0 : i32
    return %c0_i32, %c0_i32_0 : i32, i32
  }
  func.func @transform_4(%arg0: i32, %arg1: i32) -> (i32, i32) {
    %c0_i32 = arith.constant 0 : i32
    %c0_i32_0 = arith.constant 0 : i32
    %c0_i32_1 = arith.constant 0 : i32
    return %c0_i32, %c0_i32_0 : i32, i32
  }
  func.func @transform_5(%arg0: i32, %arg1: i32) -> (i32, i32) {
    %c0_i32 = arith.constant 0 : i32
    %c0_i32_0 = arith.constant 0 : i32
    %c0_i32_1 = arith.constant 0 : i32
    return %c0_i32, %c0_i32_0 : i32, i32
  }
  func.func @transform_6(%arg0: i32, %arg1: i32) -> (i32, i32) {
    %c0_i32 = arith.constant 0 : i32
    %c0_i32_0 = arith.constant 0 : i32
    %c0_i32_1 = arith.constant 0 : i32
    return %c0_i32, %c0_i32_0 : i32, i32
  }
  func.func @transform_7(%arg0: i32, %arg1: i32) -> (i32, i32) {
    %c0_i32 = arith.constant 0 : i32
    %c0_i32_0 = arith.constant 0 : i32
    %c0_i32_1 = arith.constant 0 : i32
    return %c0_i32, %c0_i32_0 : i32, i32
  }
  func.func @transform_8(%arg0: i32, %arg1: i32) -> (i32, i32) {
    %c0_i32 = arith.constant 0 : i32
    %c0_i32_0 = arith.constant 0 : i32
    %c0_i32_1 = arith.constant 0 : i32
    return %c0_i32, %c0_i32_0 : i32, i32
  }
  func.func @transform_9(%arg0: i32, %arg1: i32) -> (i32, i32, i32) {
    %c0_i32 = arith.constant 0 : i32
    %c0_i32_0 = arith.constant 0 : i32
    return %arg0, %c0_i32, %arg1 : i32, i32, i32
  }
}

</mosaic_0001>

<bundles_post_ra>
// kernel: tpu_custom_call.1
= control target key start
LH: loop header
LB: loop body
LE: loop exit
PB: predicated region body
PF: predicated region fallthrough
CT: control target
= control target key end

     0   :  { %s1523_s0 = inlined_call_operand.hbm [shape: f32[2,8,384], index: 0, kind: input, shape index: {}]   ;;  %s1524_s1 = inlined_call_operand.hbm [shape: f32[2,8,384], index: 1, kind: input, shape index: {}]   ;;  %s1525_s2 = inlined_call_operand.hbm [shape: f32[2,8,384], index: 2, kind: input, shape index: {}]   ;;  %s1526_s3 = inlined_call_operand.vmem [shape: f32[8,24], index: 3, kind: input, shape index: {}]   ;;  %s1527_s4 = inlined_call_operand.vmem [shape: f32[8,1], index: 4, kind: input, shape index: {}]   ;;  %s1528_s5 = inlined_call_operand.vmem [shape: f32[8,24], index: 5, kind: input, shape index: {}]   ;;  %s1529_s6 = inlined_call_operand.vmem [shape: f32[8,1], index: 6, kind: input, shape index: {}]   ;;  %s1530_s7 = inlined_call_operand.vmem [shape: f32[8,8], index: 7, kind: input, shape index: {}]   ;;  %s1531_s8 = inlined_call_operand.vmem [shape: f32[8,1], index: 8, kind: input, shape index: {}]   ;;  %s1532_s9 = inlined_call_operand.hbm [shape: f32[2,8,128], index: 9, kind: output, shape index: {}]  }
   0x1   :  { %1541 = sst [smem:[#allocation19_spill]] %s1523_s0 }
   0x2   :  { %1542 = sst [smem:[#allocation20_spill]] %s1524_s1 }
   0x3   :  { %14 = vsyncpa [#allocation3], 0 }
   0x4   :  { %16 = vsyncpa [#allocation3 + $0x1], 0 }
   0x5   :  { %17 = vsyncpa [#allocation6], 0 }
   0x6   :  { %19 = vsyncpa [#allocation6 + $0x1], 0 }
   0x7   :  { %20 = vsyncpa [#allocation4], 0 }
   0x8   :  { %22 = vsyncpa [#allocation4 + $0x1], 0  ;;  %s1279_s30 = smov 0   ;;  %s1281_s10 = smov 0  }
   0x9   :  { %s1283_s11 = smov 0   ;;  %s1285_s12 = smov 0  }
   0xa   :  { %s1287_s13 = smov 0   ;;  %s1289_s14 = smov 0  }
   0xb LB: > { %1543 = sst [smem:[#allocation12_spill]] %s1197_s30  ;;  %s1310_s15 = sadd.s32 4294967295, %s1217_s14   ;;  %s1217_s14 = sphi %s1289_s14, %s28_s14   ;;  %s1213_s13 = sphi %s1287_s13, %s1568_s13   ;;  %s1209_s12 = sphi %s1285_s12, %s1567_s12   ;;  %s1205_s11 = sphi %s1283_s11, %s1566_s11   ;;  %s1201_s10 = sphi %s1281_s10, %s1570_s10   ;;  %s1197_s30 = sphi %s1279_s30, %s1569_s30  }
   0xc   : > { %1544 = sst [smem:[#allocation13_spill]] %s1205_s11  ;;  %s924_s16 = sadd.s32 4294967294, %s1217_s14  }
   0xd   : > { %1545 = sst [smem:[#allocation14_spill]] %s1213_s13  ;;  %s40_s17 = sadd.s32 1, %s1213_s13 }
   0xe   : > { %1546 = sst [smem:[#allocation15_spill]] %s1217_s14  ;;  %s49_s18 = sadd.s32 1, %s1205_s11 }
   0xf   : > { %p42_p0 = scmp.ge.s32.totalorder %s40_s17, 2  ;;  %p56_p1 = scmp.ne.s32.totalorder %s1205_s11, %s1201_s10 }
  0x10   : > { %p57_p2 = scmp.eq.s32.totalorder %s1217_s14, 0  ;;  %p62_p3 = scmp.ne.s32.totalorder %s1201_s10, %s1197_s30 }
  0x11   : > { %s1572_s17 = smov (%p42_p0, %s40_s17), 0  ;;  %p63_p5 = scmp.eq.s32.totalorder %s1310_s15, 0 }
  0x12   : > { %1547 = sst [smem:[#allocation16_spill]] %s1572_s17  ;;  %p1322_p4 = por %p57_p2, %p56_p1 }
  0x13   : > { %s44_s20 = ssub.s32 %s1213_s13, %s1572_s17  ;;  %p274_p6 = scmp.eq.s32.totalorder %s1310_s15, 1 }
  0x14   : > { %p47_p7 = scmp.eq.s32.totalorder %s44_s20, 0  ;;  %p1330_p8 = por %p63_p5, %p62_p3 }
  0x15   : > { %p1334_p9 = por %p274_p6, %p56_p1  ;;  %p280_p10 = scmp.eq.s32.totalorder %s924_s16, 1 }
  0x16   : > { %s1339_s23 = scalar_select %p47_p7, %s1205_s11, %s49_s18  }
  0x17   : > { %p1341_p11 = por %p280_p10, %p62_p3  ;;  %p989_p13 = scmp.lt.s32.totalorder %s1217_s14, 2 }
  0x18   : > { %1551 = sst [smem:[#allocation17_spill]] %s1339_s23  ;;  %s1534_s25 = sand.u32 1, %s1205_s11  }
  0x19   : > { %s1552_s24 = scalar_select %p1341_p11, 1, 0 }
  0x1a   : > { %s1350_s26 = sshll.u32 %s1534_s25, 3  ;;  %s1353_s27 = smul.u32 384, %s1213_s13 }
  0x1b   : > { %1553 = sst [smem:[#allocation18_spill]] %s1552_s24  ;;  %p1357_p0 = pnand %p989_p13, %p1322_p4 }
  0x1c   : > { %s338_s29 = sand.u32 1, %s1217_s14   ;;  %s1555_s1 = sld [smem:[#allocation20_spill]] }
  0x1d   : > { %s342_s23 = scalar_lea.vmem [#allocation5], %s1350_s26  ;;  %p933_p1 = scmp.ge.s32.totalorder %s1217_s14, 1 }
  0x1e   : > { %s352_s25 = sshll.u32 %s342_s23, 4  ;;  %s1368_s13 = scalar_lea.sflag [#allocation6], %s338_s29  ;;  %s353_s25 = int_to_ptr.vmem [resolvable:$true] %s352_s25 }
  0x1f   : > { %p1049_p2 = pneg %p1357_p0  ;;  %s1060_s19 = scalar_lea.vmem %s353_s25, 128 }
  0x20   : > { %p1061_p3 = scmp.ne.s32.totalorder %s353_s25, %s1060_s19  ;;  %s1219_s24 = smov [#allocation5]  }
  0x21   : > { %s1065_s30 = sshll.u32 %s1219_s24, 4  ;;  %s1066_s30 = int_to_ptr.vmem [resolvable:$false] %s1065_s30 }
  0x22   : > { %s833_s20 = scalar_lea.hbm %s1555_s1, %s1353_s27  ;;  %p1063_p4 = pnand %p1061_p3, %p1049_p2 }
  0x23   : > { %s834_s17 = scalar_lea.hbm %s833_s20, 128  ;;  %s1067_s16 = scalar_lea.vmem %s1066_s30, 256 }
  0x24   : > { %p1064_p5 = pneg %p1063_p4  ;;  %p1068_p6 = scmp.lt.s32.totalorder %s353_s25, %s1066_s30 }
  0x25   : > { %p1069_p7 = scmp.lt.s32.totalorder %s1067_s16, %s1060_s19 }
  0x27   : > { %p1070_p10 = por %p1069_p7, %p1068_p6 }
  0x29   : > { %p1071_p13 = pnand %p1070_p10, %p1064_p5 }
  0x2b   : > { %1074 = shalt.err (!%p1071_p13)
}
  0x2c   : > { %981 = dma.hbm_to_vmem [thread:$0]  (!%p1357_p0), %s834_s17, 128, %s353_s25, %s1368_s13  }
  0x2d   : > { %p378_p3 = scmp.lt.s32.totalorder %s1217_s14, 3  ;;  %s1557_s0 = sld [smem:[#allocation19_spill]] }
  0x2e   : > { %s322_s18 = scalar_lea.vmem [#allocation2], %s1350_s26  ;;  %s1558_s19 = sand.u32 1, %s1205_s11  }
  0x2f   : > { %p1381_p4 = pnand %p933_p1, %p378_p3  ;;  %s331_s20 = sshll.u32 %s322_s18, 4  ;;  %s332_s20 = int_to_ptr.vmem [resolvable:$true] %s331_s20 }
  0x30   : > { %s319_s16 = scalar_lea.sflag [#allocation3], %s1558_s19  ;;  %s1089_s1 = scalar_lea.vmem %s332_s20, 128 }
  0x31   : > { %p1090_p5 = scmp.ne.s32.totalorder %s332_s20, %s1089_s1  ;;  %s1220_s17 = smov [#allocation2]  }
  0x32   : > { %s1094_s25 = sshll.u32 %s1220_s17, 4  ;;  %s1095_s25 = int_to_ptr.vmem [resolvable:$false] %s1094_s25 }
  0x33   : > { %s329_s29 = scalar_lea.hbm %s1557_s0, %s1353_s27  ;;  %p1092_p6 = pnand %p1090_p5, %p1049_p2 }
  0x34   : > { %s1096_s14 = scalar_lea.vmem %s1095_s25, 256  ;;  %p1097_p1 = scmp.lt.s32.totalorder %s332_s20, %s1095_s25 }
  0x35   : > { %p1093_p7 = pneg %p1092_p6  ;;  %p1098_p10 = scmp.lt.s32.totalorder %s1096_s14, %s1089_s1 }
  0x37   : > { %p1099_p13 = por %p1098_p10, %p1097_p1 }
  0x39   : > { %p1100_p3 = pnand %p1099_p13, %p1093_p7 }
  0x3b   : > { %1103 = shalt.err (!%p1100_p3)
}
  0x3c   : > { %978 = dma.hbm_to_vmem [thread:$0]  (!%p1357_p0), %s329_s29, 128, %s332_s20, %s319_s16  }
  0x3d   : > { %s841_s18 = scalar_lea.hbm %s1525_s2, %s1353_s27  ;;  %s363_s19 = scalar_lea.vmem [#allocation7], %s1350_s26 }
  0x3e   : > { %s373_s0 = sshll.u32 %s363_s19, 4  ;;  %s842_s17 = scalar_lea.hbm %s841_s18, 256  ;;  %s374_s0 = int_to_ptr.vmem [resolvable:$true] %s373_s0 }
  0x3f   : > { %s1117_s11 = scalar_lea.vmem %s374_s0, 128  ;;  %s1221_s1 = smov [#allocation7]  }
  0x40   : > { %p1118_p5 = scmp.ne.s32.totalorder %s374_s0, %s1117_s11  ;;  %s1122_s14 = sshll.u32 %s1221_s1, 4  ;;  %s1123_s14 = int_to_ptr.vmem [resolvable:$false] %s1122_s14 }
  0x41   : > { %s1124_s25 = scalar_lea.vmem %s1123_s14, 256  ;;  %p1125_p1 = scmp.lt.s32.totalorder %s374_s0, %s1123_s14 }
  0x42   : > { %p1120_p6 = pnand %p1118_p5, %p1049_p2  ;;  %p1126_p10 = scmp.lt.s32.totalorder %s1124_s25, %s1117_s11 }
  0x44   : > { %p1121_p7 = pneg %p1120_p6  ;;  %p1127_p13 = por %p1126_p10, %p1125_p1 }
  0x46   : > { %p1128_p3 = pnand %p1127_p13, %p1121_p7 }
  0x48   : > { %1131 = shalt.err (!%p1128_p3)
}
  0x49   : > { %984 = dma.hbm_to_vmem [thread:$0]  (!%p1357_p0), %s842_s17, 128, %s374_s0, %s1368_s13  }
  0x4a   : > { %382 = sbr.rel (%p1381_p4) target bundleno = 862 (0x35e), region = 56  ;;  %s1411_s26 = sand.u32 (!%p1381_p4), 1, %s1201_s10  }
  0x4b   : > { %s1414_s27 = sshll.u32 (!%p1381_p4), %s1411_s26, 3  ;;  %s385_s11 = scalar_lea.sflag (!%p1381_p4), [#allocation3], %s1411_s26 }
  0x4c   : > { %s388_s29 = scalar_lea.vmem (!%p1381_p4), [#allocation2], %s1414_s27 }
  0x4f   : > { %1184 = dma.done.wait (%p1330_p8), %s385_s11, 128  }
  0x50   : > { %1186 = vsyncadd (%p1330_p8), %s385_s11, 4294967168  ;;  %s393_s0 = sand.u32 1, %s1310_s15   ;;  %s397_s28 = scalar_lea.vmem [#allocation5], %s1414_s27 }
  0x51   : > { %s394_s13 = scalar_lea.sflag [#allocation6], %s393_s0 }
  0x52   : > { %1188 = dma.done.wait (%p1330_p8), %s394_s13, 256  }
  0x53   : > { %1190 = vsyncadd (%p1330_p8), %s394_s13, 4294967040  ;;  %v454_v0 = vld [vmem:[%s397_s28] sm:$0xff]  ;;  %v453_v1 = vld [vmem:[%s388_s29] sm:$0xff]  ;;  %s1222_s23 = smov 124   ;;  %s1223_s20 = smov 126   ;;  %vm472_vm0 = vcmask 1014784   ;;  %v580_v26 = vlaneseq }
  0x54   : > { %468 = vrot.lane.b32.xlu0 %v454_v0, %s1222_s23  ;;  %459 = vrot.lane.b32.xlu1 %v453_v1, %s1223_s20  ;;  %s406_s16 = scalar_lea.vmem [#allocation7], %s1414_s27  ;;  %s1224_s15 = smov 4   ;;  %vm465_vm1 = vcmask 1031168   ;;  %v1225_v5 = vmov 0.0   ;;  %vm1226_vm2 = vmmov 0   ;;  %v1227_v11 = vmov 0  }
  0x55   : > { %v455_v2 = vld [vmem:[%s406_s16] sm:$0xff]  ;;  %571 = vmatprep.mubr.f32.mxu0 %v1225_v5  ;;  %952 = vmatprep.subr.mxu1 %v1225_v5  ;;  %vm493_vm3 = vcmask 31744   ;;  %vm503_vm4 = vcmask 195584   ;;  %vm701_vm5 = vcmask 64512   ;;  %v581_v27 = vand.u32 127, %v580_v26  ;;  %s943_s13 = sshll.u32 %s1209_s12, 7 }
  0x56   : > { %958 = vmatprep.mubr.msk.f32.mxu1 %vm1226_vm2, %v1225_v5  ;;  %1045 = vset.pattern.permute.xlu1 %v1227_v11  ;;  %v475_v13 = vld [vmem:[%s1527_s4] sm:$0xff]  ;;  %s450_s28 = scalar_lea.vmem [#allocation8], %s1414_s27  ;;  %s779_s21 = scalar_lea.sflag [#allocation4], %s1411_s26 }
  0x57   : > { %1046 = vset.pattern.permute.xlu0 %v1227_v11  ;;  %v695_v14 = vld [vmem:[%s1531_s8] sm:$0xff]  ;;  %v586_v28 = vadd.s32 4294967294, %v581_v27  ;;  %s1228_s24 = smov [#allocation8]  }
  0x58   : > { %470 = vrot.lane.b32.xlu0 %v455_v2, %s1222_s23  ;;  %461 = vrot.lane.b32.xlu1 %v454_v0, %s1223_s20  ;;  %v474_v23 = vld [vmem:[%s1526_s3] sm:$0xff]  ;;  %s1137_s18 = sshll.u32 %s1228_s24, 4  ;;  %s1138_s18 = int_to_ptr.vmem [resolvable:$false] %s1137_s18 }
  0x59   : > { %v694_v25 = vld [vmem:[%s1530_s7] sm:$0xff]  ;;  %vm588_vm6 = vcmp.ge.s32.totalorder %v586_v28, 0  ;;  %vm590_vm7 = vcmp.lt.s32.totalorder %v586_v28, 16  ;;  %s1139_s12 = scalar_lea.vmem %s1138_s18, 256 }
  0x5a   : > { %vm1461_vm8 = vmand %vm588_vm6, %vm590_vm7  ;;  %v615_v38 = vld [vmem:[%s1529_s6] sm:$0xff] }
  0x5b   : > { %v614_v45 = vld [vmem:[%s1528_s5] sm:$0xff] }
  0x5c   : > { %463 = vrot.lane.b32.xlu0 %v455_v2, %s1223_s20 }
  0xc6   : > { %v469_v3 = vpop.permute.xlu0 %468  ;;  %v460_v4 = vpop.permute.xlu1 %459 }
  0xc7   : > { %489 = vrot.lane.b32.xlu1 %v469_v3, %s1224_s15 }
  0xca   : > { %v471_v6 = vpop.permute.xlu0 %470  ;;  %v462_v7 = vpop.permute.xlu1 %461 }
  0xcb   : > { %v473_v8 = vsel %vm472_vm0, %v469_v3, %v471_v6  ;;  %v466_v9 = vsel %vm465_vm1, %v460_v4, %v462_v7 }
  0xcc   : > { %491 = vrot.lane.b32.xlu0 %v473_v8, %s1224_s15  ;;  %485 = vrot.lane.b32.xlu1 %v466_v9, %s1224_s15 }
  0xce   : > { %v464_v10 = vpop.permute.xlu0 %463 }
  0xcf   : > { %v467_v12 = vsel %vm465_vm1, %v462_v7, %v464_v10 }
  0xd0   : > { %487 = vrot.lane.b32.xlu0 %v467_v12, %s1224_s15  ;;  %481 = vrot.lane.b32.xlu1 %v453_v1, %s1224_s15 }
  0xd4   : > { %483 = vrot.lane.b32.xlu0 %v454_v0, %s1224_s15  ;;  %478 = vperm.xlu1 %1045, %v475_v13   ;;  %s791_s15 = scalar_lea.hbm %s1532_s9, %s943_s13 }
  0xd8   : > { %610 = vrot.lane.b32.xlu1 %v1225_v5, %s1222_s23 }
  0xdc   : > { %604 = vrot.lane.b32.xlu1 %v1225_v5, %s1223_s20 }
  0xe0   : > { %698 = vperm.xlu1 %1045, %v695_v14  }
 0x139   : > { %v490_v15 = vpop.permute.xlu1 %489 }
 0x13e   : > { %v492_v16 = vpop.permute.xlu0 %491  ;;  %v486_v18 = vpop.permute.xlu1 %485 }
 0x13f   : > { %533 = vmatprep.subr.mxu0 %v492_v16  ;;  %v496_v17 = vsel %vm493_vm3, %v490_v15, %v492_v16 }
 0x140   : > { %534 = vmatpush1.msra.mxu0 %v496_v17 }
 0x142   : > { %v488_v19 = vpop.permute.xlu0 %487  ;;  %v482_v21 = vpop.permute.xlu1 %481 }
 0x143   : > { %535 = vmatprep.subr.mxu0 %v488_v19  ;;  %v495_v20 = vsel %vm493_vm3, %v486_v18, %v488_v19 }
 0x144   : > { %536 = vmatpush1.msra.mxu0 %v495_v20 }
 0x146   : > { %v484_v22 = vpop.permute.xlu0 %483 }
 0x147   : > { %537 = vmatprep.subr.mxu0 %v484_v22  ;;  %v494_v24 = vsel %vm493_vm3, %v482_v21, %v484_v22 }
 0x148   : > { %538 = vmatpush1.msra.mxu0 %v494_v24 }
 0x149   : > { %938 = vmatmul.mubr.msk.f32.vlgmr.msra.gmra.mxu0 %vm503_vm4, %v474_v23  ;;  %961 = vmatprep.subr.mxu0 %v1225_v5 }
 0x14a   : > { %962 = vmatpush3.msra.mxu0 %v454_v0  ;;  %963 = vmatprep.mubr.msk.f32.mxu0 %vm1226_vm2, %v1225_v5 }
 0x14d   : > { %964 = vmatmul.mubr.msk.f32.vlgmr.msra.gmra.mxu0 %vm701_vm5, %v694_v25 }
 0x14f   : > { %v479_v29 = vpop.permute.xlu1 %478 }
 0x153   : > { %v611_v39 = vpop.permute.xlu1 %610 }
 0x157   : > { %v605_v42 = vpop.permute.xlu1 %604 }
 0x15b   : > { %v699_v47 = vpop.permute.xlu1 %698 }
 0x209   : > { %v573_v30 = vpop.f32.mrf.mxu0 }
 0x20a   : > { %v574_v31 = vadd.f32 %v573_v30, %v479_v29 }
 0x20b   : > { %v575_v32 = vpop.f32.mrf.mxu0 }
 0x20c   : > { %v578_v34 = vmax.f32 %v574_v31, 0.0 }
 0x20d   : > { %v771_v35 = vpop.f32.mrf.mxu0 }
 0x20e   : > { %v598_v36 = vsel %vm1461_vm8, %v578_v34, 0.0  ;;  %v772_v49 = vadd.f32 %v771_v35, %v699_v47 }
 0x20f   : > { %608 = vrot.lane.b32.xlu0 %v598_v36, %s1222_s23  ;;  %v965_v37 = vpop.f32.mrf.mxu0  ;;  %s793_s23 = sshll.u32 %s450_s28, 4  ;;  %s794_s23 = int_to_ptr.vmem [resolvable:$true] %s793_s23 }
 0x210   : > { %s1133_s30 = scalar_lea.vmem %s794_s23, 128  ;;  %p1140_p4 = scmp.lt.s32.totalorder %s794_s23, %s1138_s18 }
 0x211   : > { %p1134_p8 = scmp.ne.s32.totalorder %s794_s23, %s1133_s30  ;;  %p1141_p5 = scmp.lt.s32.totalorder %s1139_s12, %s1133_s30 }
 0x213   : > { %602 = vrot.lane.b32.xlu0 %v598_v36, %s1223_s20  ;;  %p1135_p0 = pnand %p1134_p8, %p1334_p9  ;;  %p1142_p6 = por %p1141_p5, %p1140_p4 }
 0x215   : > { %p1136_p2 = pneg %p1135_p0 }
 0x217   : > { %618 = vperm.xlu0 %1046, %v615_v38   ;;  %p1143_p7 = pnand %p1142_p6, %p1136_p2 }
 0x281   : > { %v609_v40 = vpop.permute.xlu0 %608 }
 0x282   : > { %v612_v41 = vsel %vm472_vm0, %v609_v40, %v611_v39 }
 0x283   : > { %953 = vmatpush3.msra.mxu1 %v612_v41 }
 0x284   : > { %954 = vmatprep.subr.mxu1 %v1225_v5 }
 0x285   : > { %v603_v43 = vpop.permute.xlu0 %602 }
 0x286   : > { %v606_v44 = vsel %vm465_vm1, %v603_v43, %v605_v42 }
 0x287   : > { %955 = vmatpush3.msra.mxu1 %v606_v44 }
 0x288   : > { %956 = vmatprep.subr.mxu1 %v1225_v5 }
 0x289   : > { %957 = vmatpush3.msk.msra.mxu1 %vm1461_vm8, %v578_v34 }
 0x28a   : > { %959 = vmatmul.mubr.msk.f32.vlgmr.msra.gmra.mxu1 %vm503_vm4, %v614_v45 }
 0x292   : > { %v619_v46 = vpop.permute.xlu0 %618 }
 0x34a   : > { %v690_v48 = vpop.f32.mrf.mxu1 }
 0x34b   : > { %v691_v50 = vadd.f32 %v690_v48, %v619_v46 }
 0x34c   : > { %v960_v51 = vpop.f32.mrf.mxu1 }
 0x34d   : > { %v775_v52 = vadd.f32 %v772_v49, %v691_v50 }
 0x34f   : > { %v776_v53 = vmax.f32 %v775_v52, 0.0 }
 0x351   : > { %777 = vst [vmem:[%s450_s28] sm:$0xff] %v776_v53 }
 0x352   : > { %1146 = shalt.err (!%p1143_p7)
}
 0x353   : > { %s1147_s27 = scalar_lea.hbm %s791_s15, 128  ;;  %s1151_s17 = scalar_lea.hbm %s1532_s9, 256 }
 0x354   : > { %p1148_p1 = scmp.ne.s32.totalorder %s791_s15, %s1147_s27  ;;  %p1152_p3 = scmp.lt.s32.totalorder %s791_s15, %s1532_s9 }
 0x355   : > { %p1153_p8 = scmp.lt.s32.totalorder %s1151_s17, %s1147_s27 }
 0x356   : > { %p1149_p10 = pnand %p1148_p1, %p1334_p9 }
 0x357   : > { %p1154_p0 = por %p1153_p8, %p1152_p3 }
 0x358   : > { %p1150_p13 = pneg %p1149_p10 }
 0x35a   : > { %p1155_p12 = pnand %p1154_p0, %p1150_p13 }
 0x35c   : > { %1158 = shalt.err (!%p1155_p12)
}
 0x35d   : > { %973 = dma.vmem_to_hbm [thread:$0]  (%p1334_p9), %s794_s23, 128, %s791_s15, %s779_s21  }
 0x35e PF: > { %s1561_s25 = sld [smem:[#allocation12_spill]] }
 0x35f   : > { %s1563_s29 = sld [smem:[#allocation15_spill]] }
 0x364   : > { %s805_s0 = sand.u32 1, %s1561_s25  }
 0x365   : > { %p1564_p2 = scmp.ge.s32.totalorder %s1563_s29, 2  ;;  %s806_s13 = scalar_lea.sflag [#allocation4], %s805_s0 }
 0x367   : > { %p986_p4 = pnand %p1564_p2, %p1341_p11 }
 0x369   : > { %p987_p5 = pneg %p986_p4 }
 0x36b   : > { %1192 = dma.done.wait (%p987_p5), %s806_s13, 128  }
 0x36c   : > { %1194 = vsyncadd (%p987_p5), %s806_s13, 4294967168  ;;  %s28_s14 = sadd.s32 1, %s1563_s29   ;;  %s1565_s28 = sld [smem:[#allocation13_spill]] }
 0x36d   : > { %p25_p6 = scmp.ge.s32.totalorder %s28_s14, 4   ;;  %s1566_s11 = sld [smem:[#allocation17_spill]] }
 0x36e   : > { %s1567_s12 = sld [smem:[#allocation14_spill]]  ;;  %s1569_s30 = smov %s1201_s10 }
 0x36f   : > { %s1568_s13 = sld [smem:[#allocation16_spill]]  ;;  %27 = sbr.rel (!%p25_p6) target bundleno = 11 (0xb), region = 125 }
 0x372   : > { %s1570_s10 = smov %s1565_s28 }
 0x374   :  { %811 = vsyncpa [#allocation3], 1 }
 0x375   :  { %813 = vsyncpa [#allocation3 + $0x1], 1 }
 0x376   :  { %814 = vsyncpa [#allocation6], 1 }
 0x377   :  { %816 = vsyncpa [#allocation6 + $0x1], 1 }
 0x378   :  { %817 = vsyncpa [#allocation4], 1 }
 0x379   :  { %819 = vsyncpa [#allocation4 + $0x1], 1 }

</bundles_post_ra>
